<compile_context>
chip_gen: v6e
topology: v6e:2x2x1
jax: 0.10.0
libtpu: 0.0.40
codegen_flags: <defaults>
</compile_context>

<pallas_src>
import numpy as np
import jax
import jax.numpy as jnp
from jax.experimental import pallas as pl
from jax.experimental.pallas import tpu as pltpu

KSIZE = 5
SIGMA = 10.0
PAD = KSIZE // 2


def _gaussian_kernel1d(ksize: int, sigma: float) -> np.ndarray:
    # Matches torchvision.transforms.functional._get_gaussian_kernel1d
    half = (ksize - 1) * 0.5
    x = np.linspace(-half, half, ksize)
    pdf = np.exp(-0.5 * (x / sigma) ** 2)
    return (pdf / pdf.sum()).astype(np.float32)


_W1D = _gaussian_kernel1d(KSIZE, SIGMA)


def _reflect_index(i: int, n: int) -> int:
    # torch F.pad(mode="reflect") index rule (no edge repetition).
    if i < 0:
        return -i
    if i >= n:
        return 2 * n - 2 - i
    return i


def _reflect_conv_matrix(n: int, w1d: np.ndarray) -> np.ndarray:
    """M such that (x @ M)[j] = sum_t w[t] * x[reflect(j + t - PAD)]."""
    m = np.zeros((n, n), np.float32)
    for j in range(n):
        for t in range(len(w1d)):
            m[_reflect_index(j + t - PAD, n), j] += float(w1d[t])
    return m


def _hf_loss_kernel(pp_ref, ip_ref, ah_ref, aw_ref, out_ref):
    """One grid step: tb (b,c) planes -> one partial sum of |hf(p) - hf(i)|."""
    tb, H, W = pp_ref.shape
    aw = aw_ref[...]                                  # (W, W) bf16, horizontal pass
    ah = ah_ref[...]                                  # (H, H) bf16, vertical pass
    ah_b = jnp.broadcast_to(ah, (tb, H, H))           # hoisted once per grid step

    def highfreq(x_ref):
        x_raw = x_ref[...]                            # (tb, H, W) input dtype
        x_mm = x_raw.astype(jnp.bfloat16)             # MXU operands in bf16
        x_f32 = x_raw.astype(jnp.float32)             # elementwise path stays f32
        # Horizontal pass, batched across planes: one (tb*H, W) @ (W, W) matmul.
        hx = jnp.dot(x_mm.reshape(tb * H, W), aw,
                     preferred_element_type=jnp.float32)
        hx_b = hx.astype(jnp.bfloat16).reshape(tb, H, W)
        # Vertical pass as a single batched dot (no per-plane Python unroll).
        blur = jnp.einsum("bhk,bkw->bhw", ah_b, hx_b,
                          preferred_element_type=jnp.float32)
        return x_f32 - x_f32 * blur

    diff = highfreq(pp_ref) - highfreq(ip_ref)
    out_ref[...] = jnp.sum(jnp.abs(diff)).reshape(1, 1, 1)


def _plan_tiling(bc: int, h: int, w: int, itemsize: int):
    """Pick tb (planes per grid step) and a vmem_limit from real footprints."""
    try:
        vmem_cap = int(pltpu.get_tpu_info().vmem_capacity_bytes)
    except Exception:
        vmem_cap = 64 << 20                 # conservative: v7x per-TensorCore VMEM
    budget = int(0.80 * vmem_cap)           # headroom for Mosaic scratch / sems

    def footprint(tb):
        streams = 2 * 2 * tb * h * w * itemsize        # 2 inputs, double-buffered
        consts = 2 * (h * h + w * w) * 2               # bf16 conv mats (<= 2 bufs)
        temps = tb * (8 * h * w * 4 + 4 * h * w * 2 + h * h * 2)   # f32/bf16 temps
        return streams + consts + temps

    tb_max = bc if bc < 2 else bc // 2      # keep grid >= 2 -> both v7x cores busy
    tb = None
    for d in range(min(tb_max, 1024), 0, -1):          # largest divisor that fits
        if bc % d == 0 and footprint(d) <= budget:
            tb = d
            break
    if tb is None:
        # TODO(synk): row-strip the H axis with a 2-row reflect halo (direct banded
        # 5-tap path) for planes whose whole-plane footprint exceeds VMEM.
        raise ValueError(
            f"plane {h}x{w} too large for whole-plane blur in VMEM "
            f"(~{footprint(1) >> 20} MiB needed, budget {budget >> 20} MiB)")
    vmem_limit = int(min(budget, max(footprint(tb) + (2 << 20), 16 << 20)))
    return tb, vmem_limit


def high_frequency_loss(preds: jax.Array, images: jax.Array) -> jax.Array:
    """JAX/Pallas equivalent of HighFrequencyLoss.forward (NCHW inputs)."""
    assert preds.shape == images.shape, "preds/images must have the same shape"
    B, C, H, W = preds.shape
    if H <= PAD or W <= PAD:
        raise ValueError("reflect padding needs H, W > kernel_size // 2")
    BC = B * C

    preds_r = preds.reshape(BC, H, W)                 # stream raw planes once
    images_r = images.reshape(BC, H, W)

    tb, vmem_limit = _plan_tiling(BC, H, W, preds_r.dtype.itemsize)
    grid = BC // tb

    # Reflect-boundary separable 5-tap blur as two small banded matmuls (bf16
    # operands; accumulation is f32 via preferred_element_type in the kernel).
    ah = jnp.asarray(_reflect_conv_matrix(H, _W1D).T, dtype=jnp.bfloat16)  # (H, H)
    aw = jnp.asarray(_reflect_conv_matrix(W, _W1D), dtype=jnp.bfloat16)    # (W, W)

    def build(const_pipeline_mode):
        const_kwargs = ({} if const_pipeline_mode is None
                        else dict(pipeline_mode=const_pipeline_mode))
        return pl.pallas_call(
            _hf_loss_kernel,
            out_shape=jax.ShapeDtypeStruct((grid, 1, 1), jnp.float32),
            grid_spec=pltpu.PrefetchScalarGridSpec(
                num_scalar_prefetch=0,
                grid=(grid,),
                in_specs=[
                    pl.BlockSpec((tb, H, W), lambda i: (i, 0, 0)),
                    pl.BlockSpec((tb, H, W), lambda i: (i, 0, 0)),
                    pl.BlockSpec((H, H), lambda i: (0, 0), **const_kwargs),
                    pl.BlockSpec((W, W), lambda i: (0, 0), **const_kwargs),
                ],
                out_specs=pl.BlockSpec((1, 1, 1), lambda i: (i, 0, 0)),
            ),
            compiler_params=pltpu.CompilerParams(
                dimension_semantics=("parallel",),     # independent per-step partials
                vmem_limit_bytes=vmem_limit,
            ),
        )

    try:
        # Constant conv matrices: request single buffering to reclaim VMEM.
        partials = build(pl.Buffered(1))(preds_r, images_r, ah, aw)
    except Exception:
        # Fall back to default (double) buffering if this JAX/Mosaic build does
        # not accept buffer_count=1 for pallas_call block specs.
        partials = build(None)(preds_r, images_r, ah, aw)

    return jnp.sum(partials) / jnp.float32(BC * H * W)


def _reference(preds: jax.Array, images: jax.Array) -> jax.Array:
    """Pure-JAX f32 reference with identical math (sanity check only)."""
    def hf(x):
        x = x.astype(jnp.float32)
        _, _, H, W = x.shape
        xp = jnp.pad(x, ((0, 0), (0, 0), (PAD, PAD), (PAD, PAD)), mode="reflect")
        tmp = sum(float(_W1D[dx]) * xp[..., :, dx:dx + W] for dx in range(KSIZE))
        blur = sum(float(_W1D[dy]) * tmp[..., dy:dy + H, :] for dy in range(KSIZE))
        return x - x * blur
    return jnp.mean(jnp.abs(hf(preds) - hf(images)))


if __name__ == "__main__":
    key = jax.random.PRNGKey(0)
    k1, k2 = jax.random.split(key)
    preds = jax.random.normal(k1, (2, 4, 16, 16), dtype=jnp.float32)
    images = jax.random.normal(k2, (2, 4, 16, 16), dtype=jnp.float32)

    loss = high_frequency_loss(preds, images)
    jax.block_until_ready(loss)

    ref = _reference(preds, images)
    # Kernel feeds bf16 operands to the MXU (f32 accumulation), so allow a
    # slightly looser tolerance than the all-f32 reference.
    np.testing.assert_allclose(np.asarray(loss), np.asarray(ref),
                               rtol=1e-2, atol=1e-4)
    print("KERNEL_OK")
</pallas_src>

<mosaic_0001>
module attributes {stable_mosaic.version = 11 : i64} {
  func.func @_hf_loss_kernel(%arg0: i32, %arg1: memref<4x16x16xf32, #tpu.memory_space<vmem>>, %arg2: memref<4x16x16xf32, #tpu.memory_space<vmem>>, %arg3: memref<16x16xbf16, #tpu.memory_space<vmem>>, %arg4: memref<16x16xbf16, #tpu.memory_space<vmem>>, %arg5: memref<1x1x1xf32, #tpu.memory_space<vmem>>) attributes {dimension_semantics = [#tpu.dimension_semantics<parallel>], iteration_bounds = array<i64: 2>, scalar_prefetch = 0 : i64, scratch_operands = 0 : i64, tpu.core_type = #tpu.core_type<tc>, window_params = [{transform_indices = @transform_0, window_bounds = array<i64: 4, 16, 16>}, {transform_indices = @transform_1, window_bounds = array<i64: 4, 16, 16>}, {pipeline_mode = #tpu.pipeline_mode<synchronous>, transform_indices = @transform_2, window_bounds = array<i64: 16, 16>}, {pipeline_mode = #tpu.pipeline_mode<synchronous>, transform_indices = @transform_3, window_bounds = array<i64: 16, 16>}, {transform_indices = @transform_4, window_bounds = array<i64: 1, 1, 1>}]} {
    %c0 = arith.constant 0 : index
    %c0_0 = arith.constant 0 : index
    %0 = vector.load %arg4[%c0, %c0_0] : memref<16x16xbf16, #tpu.memory_space<vmem>>, vector<16x16xbf16>
    %c0_1 = arith.constant 0 : index
    %c0_2 = arith.constant 0 : index
    %1 = vector.load %arg3[%c0_1, %c0_2] : memref<16x16xbf16, #tpu.memory_space<vmem>>, vector<16x16xbf16>
    %2 = vector.shape_cast %1 : vector<16x16xbf16> to vector<1x16x16xbf16>
    %3 = vector.broadcast %2 : vector<1x16x16xbf16> to vector<4x16x16xbf16>
    %c0_3 = arith.constant 0 : index
    %c0_4 = arith.constant 0 : index
    %c0_5 = arith.constant 0 : index
    %4 = vector.load %arg1[%c0_3, %c0_4, %c0_5] : memref<4x16x16xf32, #tpu.memory_space<vmem>>, vector<4x16x16xf32>
    %5 = arith.truncf %4 : vector<4x16x16xf32> to vector<4x16x16xbf16>
    %6 = vector.shape_cast %5 : vector<4x16x16xbf16> to vector<64x16xbf16>
    %cst = arith.constant dense<0.000000e+00> : vector<64x16xf32>
    %7 = tpu.matmul %6, %0, %cst {dimension_numbers = #tpu.dot_dimension_numbers<[1], [0], [0], [1], [0, 0, 1, 1], [], []>} : vector<64x16xbf16>, vector<16x16xbf16>, vector<64x16xf32> -> vector<64x16xf32>
    %8 = arith.truncf %7 : vector<64x16xf32> to vector<64x16xbf16>
    %9 = vector.shape_cast %8 : vector<64x16xbf16> to vector<4x16x16xbf16>
    "tpu.trace_start"() <{level = 10 : i32, message = "bhk,bkw->bhw"}> : () -> ()
    %cst_6 = arith.constant dense<0.000000e+00> : vector<4x16x16xf32>
    %10 = tpu.matmul %3, %9, %cst_6 {dimension_numbers = #tpu.dot_dimension_numbers<[2], [1], [1], [2], [0, 0, 0, 1, 1, 2], [0], [0]>} : vector<4x16x16xbf16>, vector<4x16x16xbf16>, vector<4x16x16xf32> -> vector<4x16x16xf32>
    "tpu.trace_stop"() : () -> ()
    %11 = arith.mulf %4, %10 : vector<4x16x16xf32>
    %12 = arith.subf %4, %11 : vector<4x16x16xf32>
    %c0_7 = arith.constant 0 : index
    %c0_8 = arith.constant 0 : index
    %c0_9 = arith.constant 0 : index
    %13 = vector.load %arg2[%c0_7, %c0_8, %c0_9] : memref<4x16x16xf32, #tpu.memory_space<vmem>>, vector<4x16x16xf32>
    %14 = arith.truncf %13 : vector<4x16x16xf32> to vector<4x16x16xbf16>
    %15 = vector.shape_cast %14 : vector<4x16x16xbf16> to vector<64x16xbf16>
    %cst_10 = arith.constant dense<0.000000e+00> : vector<64x16xf32>
    %16 = tpu.matmul %15, %0, %cst_10 {dimension_numbers = #tpu.dot_dimension_numbers<[1], [0], [0], [1], [0, 0, 1, 1], [], []>} : vector<64x16xbf16>, vector<16x16xbf16>, vector<64x16xf32> -> vector<64x16xf32>
    %17 = arith.truncf %16 : vector<64x16xf32> to vector<64x16xbf16>
    %18 = vector.shape_cast %17 : vector<64x16xbf16> to vector<4x16x16xbf16>
    "tpu.trace_start"() <{level = 10 : i32, message = "bhk,bkw->bhw"}> : () -> ()
    %cst_11 = arith.constant dense<0.000000e+00> : vector<4x16x16xf32>
    %19 = tpu.matmul %3, %18, %cst_11 {dimension_numbers = #tpu.dot_dimension_numbers<[2], [1], [1], [2], [0, 0, 0, 1, 1, 2], [0], [0]>} : vector<4x16x16xbf16>, vector<4x16x16xbf16>, vector<4x16x16xf32> -> vector<4x16x16xf32>
    "tpu.trace_stop"() : () -> ()
    %20 = arith.mulf %13, %19 : vector<4x16x16xf32>
    %21 = arith.subf %13, %20 : vector<4x16x16xf32>
    %22 = arith.subf %12, %21 : vector<4x16x16xf32>
    %23 = math.absf %22 : vector<4x16x16xf32>
    %24 = vector.shape_cast %23 : vector<4x16x16xf32> to vector<1x4x16x16xf32>
    %cst_12 = arith.constant dense<0.000000e+00> : vector<1xf32>
    %25 = vector.multi_reduction <add>, %24, %cst_12 [1, 2, 3] : vector<1x4x16x16xf32> to vector<1xf32>
    %26 = vector.shape_cast %25 : vector<1xf32> to vector<1x1x1x1xf32>
    %27 = vector.extract %26[0, 0, 0, 0] : f32 from vector<1x1x1x1xf32>
    %28 = vector.broadcast %27 : f32 to vector<1x1x1xf32>
    %c0_13 = arith.constant 0 : index
    %c0_14 = arith.constant 0 : index
    %c0_15 = arith.constant 0 : index
    %29 = vector.load %arg5[%c0_13, %c0_14, %c0_15] : memref<1x1x1xf32, #tpu.memory_space<vmem>>, vector<1x1x1xf32>
    tpu.vector_store %arg5[%c0_13, %c0_14, %c0_15], %28 {strides = array<i32>} : memref<1x1x1xf32, #tpu.memory_space<vmem>>, vector<1x1x1xf32>,
    return
  }
  func.func @transform_0(%arg0: i32) -> (i32, i32, i32) {
    %c0_i32 = arith.constant 0 : i32
    %c0_i32_0 = arith.constant 0 : i32
    %c0_i32_1 = arith.constant 0 : i32
    return %arg0, %c0_i32, %c0_i32_0 : i32, i32, i32
  }
  func.func @transform_1(%arg0: i32) -> (i32, i32, i32) {
    %c0_i32 = arith.constant 0 : i32
    %c0_i32_0 = arith.constant 0 : i32
    %c0_i32_1 = arith.constant 0 : i32
    return %arg0, %c0_i32, %c0_i32_0 : i32, i32, i32
  }
  func.func @transform_2(%arg0: i32) -> (i32, i32) {
    %c0_i32 = arith.constant 0 : i32
    %c0_i32_0 = arith.constant 0 : i32
    %c0_i32_1 = arith.constant 0 : i32
    return %c0_i32, %c0_i32_0 : i32, i32
  }
  func.func @transform_3(%arg0: i32) -> (i32, i32) {
    %c0_i32 = arith.constant 0 : i32
    %c0_i32_0 = arith.constant 0 : i32
    %c0_i32_1 = arith.constant 0 : i32
    return %c0_i32, %c0_i32_0 : i32, i32
  }
  func.func @transform_4(%arg0: i32) -> (i32, i32, i32) {
    %c0_i32 = arith.constant 0 : i32
    %c0_i32_0 = arith.constant 0 : i32
    %c0_i32_1 = arith.constant 0 : i32
    return %arg0, %c0_i32, %c0_i32_0 : i32, i32, i32
  }
}

module attributes {stable_mosaic.version = 11 : i64} {
  func.func @_hf_loss_kernel(%arg0: i32, %arg1: memref<4x16x16xf32, #tpu.memory_space<vmem>>, %arg2: memref<4x16x16xf32, #tpu.memory_space<vmem>>, %arg3: memref<16x16xbf16, #tpu.memory_space<vmem>>, %arg4: memref<16x16xbf16, #tpu.memory_space<vmem>>, %arg5: memref<1x1x1xf32, #tpu.memory_space<vmem>>) attributes {dimension_semantics = [#tpu.dimension_semantics<parallel>], iteration_bounds = array<i64: 2>, scalar_prefetch = 0 : i64, scratch_operands = 0 : i64, tpu.core_type = #tpu.core_type<tc>, window_params = [{transform_indices = @transform_0, window_bounds = array<i64: 4, 16, 16>}, {transform_indices = @transform_1, window_bounds = array<i64: 4, 16, 16>}, {pipeline_mode = #tpu.pipeline_mode<synchronous>, transform_indices = @transform_2, window_bounds = array<i64: 16, 16>}, {pipeline_mode = #tpu.pipeline_mode<synchronous>, transform_indices = @transform_3, window_bounds = array<i64: 16, 16>}, {transform_indices = @transform_4, window_bounds = array<i64: 1, 1, 1>}]} {
    %c0 = arith.constant 0 : index
    %c0_0 = arith.constant 0 : index
    %0 = vector.load %arg4[%c0, %c0_0] : memref<16x16xbf16, #tpu.memory_space<vmem>>, vector<16x16xbf16>
    %c0_1 = arith.constant 0 : index
    %c0_2 = arith.constant 0 : index
    %1 = vector.load %arg3[%c0_1, %c0_2] : memref<16x16xbf16, #tpu.memory_space<vmem>>, vector<16x16xbf16>
    %2 = vector.shape_cast %1 : vector<16x16xbf16> to vector<1x16x16xbf16>
    %3 = vector.broadcast %2 : vector<1x16x16xbf16> to vector<4x16x16xbf16>
    %c0_3 = arith.constant 0 : index
    %c0_4 = arith.constant 0 : index
    %c0_5 = arith.constant 0 : index
    %4 = vector.load %arg1[%c0_3, %c0_4, %c0_5] : memref<4x16x16xf32, #tpu.memory_space<vmem>>, vector<4x16x16xf32>
    %5 = arith.truncf %4 : vector<4x16x16xf32> to vector<4x16x16xbf16>
    %6 = vector.shape_cast %5 : vector<4x16x16xbf16> to vector<64x16xbf16>
    %cst = arith.constant dense<0.000000e+00> : vector<64x16xf32>
    %7 = tpu.matmul %6, %0, %cst {dimension_numbers = #tpu.dot_dimension_numbers<[1], [0], [0], [1], [0, 0, 1, 1], [], []>} : vector<64x16xbf16>, vector<16x16xbf16>, vector<64x16xf32> -> vector<64x16xf32>
    %8 = arith.truncf %7 : vector<64x16xf32> to vector<64x16xbf16>
    %9 = vector.shape_cast %8 : vector<64x16xbf16> to vector<4x16x16xbf16>
    "tpu.trace_start"() <{level = 10 : i32, message = "bhk,bkw->bhw"}> : () -> ()
    %cst_6 = arith.constant dense<0.000000e+00> : vector<4x16x16xf32>
    %10 = tpu.matmul %3, %9, %cst_6 {dimension_numbers = #tpu.dot_dimension_numbers<[2], [1], [1], [2], [0, 0, 0, 1, 1, 2], [0], [0]>} : vector<4x16x16xbf16>, vector<4x16x16xbf16>, vector<4x16x16xf32> -> vector<4x16x16xf32>
    "tpu.trace_stop"() : () -> ()
    %11 = arith.mulf %4, %10 : vector<4x16x16xf32>
    %12 = arith.subf %4, %11 : vector<4x16x16xf32>
    %c0_7 = arith.constant 0 : index
    %c0_8 = arith.constant 0 : index
    %c0_9 = arith.constant 0 : index
    %13 = vector.load %arg2[%c0_7, %c0_8, %c0_9] : memref<4x16x16xf32, #tpu.memory_space<vmem>>, vector<4x16x16xf32>
    %14 = arith.truncf %13 : vector<4x16x16xf32> to vector<4x16x16xbf16>
    %15 = vector.shape_cast %14 : vector<4x16x16xbf16> to vector<64x16xbf16>
    %cst_10 = arith.constant dense<0.000000e+00> : vector<64x16xf32>
    %16 = tpu.matmul %15, %0, %cst_10 {dimension_numbers = #tpu.dot_dimension_numbers<[1], [0], [0], [1], [0, 0, 1, 1], [], []>} : vector<64x16xbf16>, vector<16x16xbf16>, vector<64x16xf32> -> vector<64x16xf32>
    %17 = arith.truncf %16 : vector<64x16xf32> to vector<64x16xbf16>
    %18 = vector.shape_cast %17 : vector<64x16xbf16> to vector<4x16x16xbf16>
    "tpu.trace_start"() <{level = 10 : i32, message = "bhk,bkw->bhw"}> : () -> ()
    %cst_11 = arith.constant dense<0.000000e+00> : vector<4x16x16xf32>
    %19 = tpu.matmul %3, %18, %cst_11 {dimension_numbers = #tpu.dot_dimension_numbers<[2], [1], [1], [2], [0, 0, 0, 1, 1, 2], [0], [0]>} : vector<4x16x16xbf16>, vector<4x16x16xbf16>, vector<4x16x16xf32> -> vector<4x16x16xf32>
    "tpu.trace_stop"() : () -> ()
    %20 = arith.mulf %13, %19 : vector<4x16x16xf32>
    %21 = arith.subf %13, %20 : vector<4x16x16xf32>
    %22 = arith.subf %12, %21 : vector<4x16x16xf32>
    %23 = math.absf %22 : vector<4x16x16xf32>
    %24 = vector.shape_cast %23 : vector<4x16x16xf32> to vector<1x4x16x16xf32>
    %cst_12 = arith.constant dense<0.000000e+00> : vector<1xf32>
    %25 = vector.multi_reduction <add>, %24, %cst_12 [1, 2, 3] : vector<1x4x16x16xf32> to vector<1xf32>
    %26 = vector.shape_cast %25 : vector<1xf32> to vector<1x1x1x1xf32>
    %27 = vector.extract %26[0, 0, 0, 0] : f32 from vector<1x1x1x1xf32>
    %28 = vector.broadcast %27 : f32 to vector<1x1x1xf32>
    %c0_13 = arith.constant 0 : index
    %c0_14 = arith.constant 0 : index
    %c0_15 = arith.constant 0 : index
    %29 = vector.load %arg5[%c0_13, %c0_14, %c0_15] : memref<1x1x1xf32, #tpu.memory_space<vmem>>, vector<1x1x1xf32>
    tpu.vector_store %arg5[%c0_13, %c0_14, %c0_15], %28 {strides = array<i32>} : memref<1x1x1xf32, #tpu.memory_space<vmem>>, vector<1x1x1xf32>,
    return
  }
  func.func @transform_0(%arg0: i32) -> (i32, i32, i32) {
    %c0_i32 = arith.constant 0 : i32
    %c0_i32_0 = arith.constant 0 : i32
    %c0_i32_1 = arith.constant 0 : i32
    return %arg0, %c0_i32, %c0_i32_0 : i32, i32, i32
  }
  func.func @transform_1(%arg0: i32) -> (i32, i32, i32) {
    %c0_i32 = arith.constant 0 : i32
    %c0_i32_0 = arith.constant 0 : i32
    %c0_i32_1 = arith.constant 0 : i32
    return %arg0, %c0_i32, %c0_i32_0 : i32, i32, i32
  }
  func.func @transform_2(%arg0: i32) -> (i32, i32) {
    %c0_i32 = arith.constant 0 : i32
    %c0_i32_0 = arith.constant 0 : i32
    %c0_i32_1 = arith.constant 0 : i32
    return %c0_i32, %c0_i32_0 : i32, i32
  }
  func.func @transform_3(%arg0: i32) -> (i32, i32) {
    %c0_i32 = arith.constant 0 : i32
    %c0_i32_0 = arith.constant 0 : i32
    %c0_i32_1 = arith.constant 0 : i32
    return %c0_i32, %c0_i32_0 : i32, i32
  }
  func.func @transform_4(%arg0: i32) -> (i32, i32, i32) {
    %c0_i32 = arith.constant 0 : i32
    %c0_i32_0 = arith.constant 0 : i32
    %c0_i32_1 = arith.constant 0 : i32
    return %arg0, %c0_i32, %c0_i32_0 : i32, i32, i32
  }
}

</mosaic_0001>

<bundles_post_ra>
// kernel: tpu_custom_call.1
= control target key start
LH: loop header
LB: loop body
LE: loop exit
PB: predicated region body
PF: predicated region fallthrough
CT: control target
= control target key end

     0   :  { %9 = vsyncpa [#allocation3], 0  ;;  %s1749_s0 = inlined_call_operand.hbm [shape: f32[8,16,16], index: 0, kind: input, shape index: {}]   ;;  %s1750_s1 = inlined_call_operand.hbm [shape: f32[8,16,16], index: 1, kind: input, shape index: {}]   ;;  %s1751_s2 = inlined_call_operand.hbm [shape: bf16[16,16], index: 2, kind: input, shape index: {}]   ;;  %s1752_s3 = inlined_call_operand.hbm [shape: bf16[16,16], index: 3, kind: input, shape index: {}]   ;;  %s1753_s4 = inlined_call_operand.vmem [shape: f32[2,1,1], index: 4, kind: output, shape index: {}]  }
   0x1   :  { %11 = vsyncpa [#allocation3 + $0x1], 0 }
   0x2   :  { %12 = vsyncpa [#allocation5], 0 }
   0x3   :  { %14 = vsyncpa [#allocation5 + $0x1], 0 }
   0x4   :  { %15 = vsyncpa [#allocation8], 0  ;;  %s1399_s15 = smov 0   ;;  %s1401_s16 = smov 0  }
   0x5   :  { %s1403_s17 = smov 0   ;;  %s1405_s18 = smov 0  }
   0x6 LB: > { %s1418_s19 = sadd.s32 4294967295, %s1362_s18   ;;  %p41_p0 = scmp.ne.s32.totalorder %s1354_s16, %s1350_s15  ;;  %s1362_s18 = sphi %s1405_s18, %s1768_s18   ;;  %s1358_s17 = sphi %s1403_s17, %s1767_s17   ;;  %s1354_s16 = sphi %s1401_s16, %s1766_s16   ;;  %s1350_s15 = sphi %s1399_s15, %s1765_s15  }
   0x7   : > { %p1754_p1 = scmp.eq.s32.totalorder %s1418_s19, 0  ;;  %p998_p2 = scmp.ge.s32.totalorder %s1362_s18, 1 }
   0x8   : > { %p146_p3 = scmp.lt.s32.totalorder %s1362_s18, 3  ;;  %s1364_s22 = smov [#allocation6]  }
   0x9   : > { %p1426_p4 = por %p1754_p1, %p41_p0  ;;  %s158_s23 = sshll.u32 %s1364_s22, 4  ;;  %s159_s23 = int_to_ptr.vmem [resolvable:$true] %s158_s23 }
   0xa   : > { %p1430_p5 = pnand %p998_p2, %p146_p3  ;;  %s1365_s25 = smov [#allocation7]  }
   0xb   : > { %s1756_s20 = scalar_select %p1426_p4, 1, 0 }
   0xc   : > { %p1147_p6 = pneg %p1430_p5  ;;  %s171_s26 = sshll.u32 %s1365_s25, 4  ;;  %s172_s26 = int_to_ptr.vmem [resolvable:$true] %s171_s26 }
   0xd   : > { %s1219_s27 = scalar_lea.vmem %s159_s23, 128  ;;  %p1227_p12 = scmp.lt.s32.totalorder %s159_s23, %s159_s23 }
   0xe   : > { %p1438_p7 = pnand %p1147_p6, %p1754_p1  ;;  %p1220_p9 = scmp.ne.s32.totalorder %s159_s23, %s1219_s27 }
   0xf   : > { %p1228_p13 = scmp.lt.s32.totalorder %s1219_s27, %s1219_s27 }
  0x10   : > { %p1210_p8 = pneg %p1438_p7 }
  0x11   : > { %p1229_p0 = por %p1228_p13, %p1227_p12 }
  0x12   : > { %p1222_p10 = pnand %p1220_p9, %p1210_p8 }
  0x14   : > { %p1223_p11 = pneg %p1222_p10 }
  0x16   : > { %p1230_p2 = pnand %p1229_p0, %p1223_p11 }
  0x18   : > { %1233 = shalt.err (!%p1230_p2)
}
  0x19   : > { %s1366_s28 = smov 64   ;;  %s1367_s29 = smov 4  }
  0x1a   : > { %1150 = dma.hbm_to_vmem [thread:$0]  (!%p1438_p7), %s1751_s2, 128, %s159_s23, [#allocation5], %s1366_s28, %s1366_s28, %s1367_s29  }
  0x1b   : > { %s1245_s6 = scalar_lea.vmem %s172_s26, 128  ;;  %p1253_p10 = scmp.lt.s32.totalorder %s172_s26, %s172_s26 }
  0x1c   : > { %p1246_p3 = scmp.ne.s32.totalorder %s172_s26, %s1245_s6  ;;  %p1254_p1 = scmp.lt.s32.totalorder %s1245_s6, %s1245_s6 }
  0x1e   : > { %p1248_p6 = pnand %p1246_p3, %p1210_p8  ;;  %p1255_p12 = por %p1254_p1, %p1253_p10 }
  0x20   : > { %p1249_p9 = pneg %p1248_p6 }
  0x22   : > { %p1256_p11 = pnand %p1255_p12, %p1249_p9 }
  0x24   : > { %1259 = shalt.err (!%p1256_p11)
}
  0x25   : > { %1153 = dma.hbm_to_vmem [thread:$0]  (!%p1438_p7), %s1752_s3, 128, %s172_s26, [#allocation8], %s1366_s28, %s1366_s28, %s1367_s29  }
  0x26   : > { %s1461_s9 = sadd.s32 1, %s1362_s18   ;;  %s28_s10 = sadd.s32 1, %s1358_s17 }
  0x27   : > { %s25_s11 = ssub.s32 %s1362_s18, %s1461_s9  ;;  %p35_p1 = scmp.ne.s32.totalorder %s1358_s17, %s1354_s16 }
  0x28   : > { %p26_p8 = scmp.eq.s32.totalorder %s25_s11, 0  ;;  %p36_p13 = scmp.eq.s32.totalorder %s1362_s18, 0 }
  0x29   : > { %p1163_p0 = scmp.lt.s32.totalorder %s1362_s18, 2  ;;  %s185_s12 = sand.u32 1, %s1358_s17  }
  0x2a   : > { %s1472_s13 = scalar_select %p26_p8, %s1358_s17, %s28_s10  }
  0x2b   : > { %p37_p2 = por %p36_p13, %p35_p1  ;;  %s1474_s14 = sshll.u32 %s185_s12, 6 }
  0x2c   : > { %s1036_s15 = sshll.u32 %s1362_s18, 10  ;;  %s189_s25 = scalar_lea.vmem [#allocation2], %s1474_s14 }
  0x2d   : > { %s1482_s24 = scalar_lea.hbm %s1749_s0, %s1036_s15  ;;  %s197_s26 = sshll.u32 %s189_s25, 4  ;;  %s1489_s26 = int_to_ptr.vmem [resolvable:$true] %s197_s26 }
  0x2e   : > { %p1485_p7 = pnand %p1163_p0, %p37_p2  ;;  %s1491_s28 = scalar_lea.sflag [#allocation3], %s185_s12 }
  0x2f   : > { %s1260_s29 = scalar_lea.hbm %s1482_s24, 1024  ;;  %s1265_s6 = scalar_lea.hbm %s1749_s0, 2048 }
  0x30   : > { %p1261_p3 = scmp.ne.s32.totalorder %s1482_s24, %s1260_s29  ;;  %p1262_p6 = pneg %p1485_p7 }
  0x31   : > { %p1266_p12 = scmp.lt.s32.totalorder %s1482_s24, %s1749_s0  ;;  %p1267_p11 = scmp.lt.s32.totalorder %s1265_s6, %s1260_s29 }
  0x32   : > { %p1263_p9 = pnand %p1262_p6, %p1261_p3 }
  0x33   : > { %p1268_p1 = por %p1267_p11, %p1266_p12 }
  0x34   : > { %p1264_p10 = pneg %p1263_p9 }
  0x36   : > { %p1269_p8 = pnand %p1268_p1, %p1264_p10 }
  0x38   : > { %1272 = shalt.err (!%p1269_p8)
}
  0x39   : > { %s1273_s10 = scalar_lea.vmem %s1489_s26, 1024  ;;  %s1368_s11 = smov [#allocation2]  }
  0x3a   : > { %p1274_p13 = scmp.ne.s32.totalorder %s1489_s26, %s1273_s10  ;;  %s1278_s12 = sshll.u32 %s1368_s11, 4  ;;  %s1279_s12 = int_to_ptr.vmem [resolvable:$false] %s1278_s12 }
  0x3b   : > { %s1280_s22 = scalar_lea.vmem %s1279_s12, 2048  ;;  %p1281_p3 = scmp.lt.s32.totalorder %s1489_s26, %s1279_s12 }
  0x3c   : > { %p1276_p0 = pnand %p1274_p13, %p1262_p6  ;;  %p1282_p9 = scmp.lt.s32.totalorder %s1280_s22, %s1273_s10 }
  0x3e   : > { %p1277_p2 = pneg %p1276_p0  ;;  %p1283_p4 = por %p1282_p9, %p1281_p3 }
  0x40   : > { %p1284_p12 = pnand %p1283_p4, %p1277_p2 }
  0x42   : > { %1287 = shalt.err (!%p1284_p12)
}
  0x43   : > { %s1369_s23 = smov 128   ;;  %s1370_s25 = smov 8  }
  0x44   : > { %1157 = dma.hbm_to_vmem [thread:$0]  (!%p1485_p7), %s1482_s24, 1024, %s1489_s26, %s1491_s28, %s1369_s23, %s1369_s23, %s1370_s25  }
  0x45   : > { %s1526_s5 = scalar_lea.hbm %s1750_s1, %s1036_s15  ;;  %s211_s6 = scalar_lea.vmem [#allocation4], %s1474_s14 }
  0x46   : > { %s219_s7 = sshll.u32 %s211_s6, 4  ;;  %s207_s8 = sand.u32 1, %s1362_s18   ;;  %s1530_s7 = int_to_ptr.vmem [resolvable:$true] %s219_s7 }
  0x47   : > { %s208_s10 = scalar_lea.sflag [#allocation5], %s207_s8  ;;  %s1288_s11 = scalar_lea.hbm %s1526_s5, 1024 }
  0x48   : > { %p1289_p4 = scmp.ne.s32.totalorder %s1526_s5, %s1288_s11  ;;  %s1293_s15 = scalar_lea.hbm %s1750_s1, 2048 }
  0x49   : > { %p1294_p1 = scmp.lt.s32.totalorder %s1526_s5, %s1750_s1  ;;  %p1295_p8 = scmp.lt.s32.totalorder %s1293_s15, %s1288_s11 }
  0x4a   : > { %p1291_p10 = pnand %p1289_p4, %p1262_p6 }
  0x4b   : > { %p1296_p13 = por %p1295_p8, %p1294_p1 }
  0x4c   : > { %p1292_p11 = pneg %p1291_p10 }
  0x4e   : > { %p1297_p0 = pnand %p1296_p13, %p1292_p11 }
  0x50   : > { %1300 = shalt.err (!%p1297_p0)
}
  0x51   : > { %s1301_s18 = scalar_lea.vmem %s1530_s7, 1024  ;;  %s1371_s14 = smov [#allocation4]  }
  0x52   : > { %p1302_p2 = scmp.ne.s32.totalorder %s1530_s7, %s1301_s18  ;;  %s1306_s22 = sshll.u32 %s1371_s14, 4  ;;  %s1307_s22 = int_to_ptr.vmem [resolvable:$false] %s1306_s22 }
  0x53   : > { %s1308_s29 = scalar_lea.vmem %s1307_s22, 2048  ;;  %p1309_p12 = scmp.lt.s32.totalorder %s1530_s7, %s1307_s22 }
  0x54   : > { %p1304_p3 = pnand %p1302_p2, %p1262_p6  ;;  %p1310_p4 = scmp.lt.s32.totalorder %s1308_s29, %s1301_s18 }
  0x56   : > { %p1305_p9 = pneg %p1304_p3  ;;  %p1311_p10 = por %p1310_p4, %p1309_p12 }
  0x58   : > { %p1312_p1 = pnand %p1311_p10, %p1305_p9 }
  0x5a   : > { %1315 = shalt.err (!%p1312_p1)
}
  0x5b   : > { %1160 = dma.hbm_to_vmem [thread:$0]  (!%p1485_p7), %s1526_s5, 1024, %s1530_s7, %s208_s10, %s1369_s23, %s1369_s23, %s1370_s25  }
  0x5c   : > { %231 = sbr.rel (%p1430_p5) target bundleno = 962 (0x3c2), region = 36  ;;  %s233_s30 = sand.u32 (!%p1430_p5), 1, %s1354_s16  }
  0x5d   : > { %s1011_s6 = sshll.u32 (!%p1430_p5), %s233_s30, 6  ;;  %s234_s8 = scalar_lea.sflag (!%p1430_p5), [#allocation3], %s233_s30 }
  0x5e   : > { %s237_s11 = scalar_lea.vmem (!%p1430_p5), [#allocation2], %s1011_s6  ;;  %p1760_p6 = scmp.ne.s32.totalorder (!%p1430_p5), %s1756_s20, 0 }
  0x61   : > { %1333 = dma.done.wait (%p1760_p6), %s234_s8, 1024  }
  0x62   : > { %1335 = vsyncadd (%p1760_p6), %s234_s8, 4294966272  ;;  %s242_s27 = sand.u32 1, %s1418_s19   ;;  %s1565_s26 = scalar_lea.vmem [#allocation4], %s1011_s6 }
  0x63   : > { %s243_s24 = scalar_lea.sflag [#allocation5], %s242_s27 }
  0x64   : > { %1337 = dma.done.wait (%p1760_p6), %s243_s24, 1024  }
  0x65   : > { %1339 = vsyncadd (%p1760_p6), %s243_s24, 4294966272  ;;  %p1761_p5 = scmp.eq.s32.totalorder %s1418_s19, 0 }
  0x67   : > { %1341 = dma.done.wait (%p1761_p5), [#allocation5], 128   ;;  %p1762_p7 = pmov %p1761_p5 }
  0x68   : > { %p1763_p11 = pmov %p1761_p5 }
  0x69   : > { %1343 = vsyncadd (%p1762_p7), [#allocation5], 4294967168 }
  0x6a   : > { %1345 = dma.done.wait (%p1763_p11), [#allocation8], 128   ;;  %p1764_p8 = pmov %p1761_p5 }
  0x6b   : > { %v1206_v0 = vld [vmem:[#allocation7] sm:$0xff]   ;;  %v1579_v1 = vld [vmem:[%s237_s11] sm:$0xff]  ;;  %vm310_vm0 = vcmask 130048   ;;  %v1583_v3 = vld [vmem:[%s237_s11 + $0x10] sm:$0xff]  ;;  %v1372_v13 = vmov 0.0   ;;  %vm1373_vm1 = vmmov 0  }
  0x6c   : > { %1347 = vsyncadd (%p1764_p8), [#allocation8], 4294967168  ;;  %v1581_v2 = vld [vmem:[%s237_s11 + $0x8] sm:$0xff]  ;;  %1065 = vmatprep.subr.bf16.mxu0 %v1206_v0  ;;  %v1587_v5 = vld [vmem:[%s237_s11 + $0x18] sm:$0xff]  ;;  %1075 = vmatprep.subr.bf16.mxu1 %v1372_v13  ;;  %p284_p13 = scmp.lt.s32.totalorder %s1418_s19, 1  ;;  %vm894_vm2 = vcmask 0  }
  0x6d   : > { %v300_v4 = vpack.c.bf16 %v1581_v2, %v1579_v1  ;;  %v1589_v6 = vld [vmem:[%s237_s11 + $0x20] sm:$0xff]  ;;  %v1591_v7 = vld [vmem:[%s237_s11 + $0x28] sm:$0xff]  ;;  %1066 = vmatpush3.bf16.msra.mxu0 %v1206_v0  ;;  %v301_v8 = vpack.c.bf16 %v1587_v5, %v1583_v3  ;;  %v1600_v10 = vld [vmem:[%s237_s11 + $0x30] sm:$0xff]  ;;  %1077 = vmatprep.mubr.msk.bf16.mxu1 %vm1373_vm1, %v1372_v13 }
  0x6e   : > { %v302_v9 = vpack.c.bf16 %v1591_v7, %v1589_v6  ;;  %v1602_v11 = vld [vmem:[%s237_s11 + $0x38] sm:$0xff]  ;;  %1087 = vmatprep.subr.bf16.mxu0 %v1372_v13  ;;  %v1613_v20 = vld [vmem:[#allocation6] sm:$0xff]   ;;  %v1625_v27 = vld [vmem:[%s1565_s26 + $0x8] sm:$0xff]  ;;  %s1770_s19 = smov (!%p284_p13, %s1418_s19), 1 }
  0x6f   : > { %1067 = vmatprep.mubr.msk.bf16.mxu0 %vm310_vm0, %v300_v4  ;;  %v303_v12 = vpack.c.bf16 %v1602_v11, %v1600_v10  ;;  %v1622_v26 = vld [vmem:[%s1565_s26] sm:$0xff]  ;;  %v1634_v30 = vld [vmem:[%s1565_s26 + $0x10] sm:$0xff]  ;;  %v1637_v31 = vld [vmem:[%s1565_s26 + $0x18] sm:$0xff]  ;;  %s286_s23 = scalar_lea.vmem %s1753_s4, %s1770_s19 }
  0x70   : > { %1068 = vmatmul.mubr.msk.bf16.vlgmr.msra.gmra.mxu0 %vm310_vm0, %v301_v8  ;;  %v588_v28 = vpack.c.bf16 %v1625_v27, %v1622_v26  ;;  %v1641_v32 = vld [vmem:[%s1565_s26 + $0x20] sm:$0xff]  ;;  %v1644_v33 = vld [vmem:[%s1565_s26 + $0x28] sm:$0xff]  ;;  %v589_v34 = vpack.c.bf16 %v1637_v31, %v1634_v30  ;;  %v1659_v36 = vld [vmem:[%s1565_s26 + $0x30] sm:$0xff] }
  0x71   : > { %1071 = vmatprep.mubr.msk.bf16.mxu0 %vm310_vm0, %v302_v9  ;;  %v590_v35 = vpack.c.bf16 %v1644_v33, %v1641_v32  ;;  %v1662_v37 = vld [vmem:[%s1565_s26 + $0x38] sm:$0xff] }
  0x72   : > { %v591_v38 = vpack.c.bf16 %v1662_v37, %v1659_v36 }
  0x78   : > { %1072 = vmatmul.mubr.msk.bf16.gmra.mxu0 %vm310_vm0, %v303_v12 }
  0x79   : > { %1089 = vmatprep.mubr.msk.bf16.mxu0 %vm1373_vm1, %v1372_v13 }
 0x130   : > { %v1069_v14 = vpop.f32.mrf.mxu0 }
 0x132   : > { %v357_v15 = vpop.f32.mrf.mxu0 }
 0x134   : > { %v1070_v16 = vpop.f32.mrf.mxu0 }
 0x135   : > { %v389_v22 = vpack.c.bf16 %v1070_v16, %v1069_v14 }
 0x136   : > { %v360_v17 = vpop.f32.mrf.mxu0 }
 0x137   : > { %v388_v18 = vpack.c.bf16 %v360_v17, %v357_v15 }
 0x138   : > { %v1073_v19 = vpop.f32.mrf.mxu0 }
 0x139   : > { %1076 = vmatpush3.bf16.msra.mxu1 %v388_v18 }
 0x13a   : > { %v373_v21 = vpop.f32.mrf.mxu0  ;;  %1081 = vmatprep.subr.bf16.mxu1 %v1372_v13 }
 0x13c   : > { %v1074_v23 = vpop.f32.mrf.mxu0  ;;  %1078 = vmatmul.mubr.msk.bf16.vlgmr.msra.gmra.mxu1 %vm310_vm0, %v1613_v20 }
 0x13d   : > { %1082 = vmatpush3.bf16.msra.mxu1 %v389_v22  ;;  %1083 = vmatprep.mubr.msk.bf16.mxu1 %vm1373_vm1, %v1372_v13  ;;  %v391_v29 = vpack.c.bf16 %v1074_v23, %v1073_v19 }
 0x13e   : > { %v376_v24 = vpop.f32.mrf.mxu0  ;;  %1093 = vmatprep.subr.bf16.mxu1 %v1372_v13 }
 0x13f   : > { %v390_v25 = vpack.c.bf16 %v376_v24, %v373_v21 }
 0x141   : > { %1088 = vmatpush3.bf16.msra.mxu0 %v390_v25 }
 0x142   : > { %1099 = vmatprep.subr.bf16.mxu0 %v1206_v0 }
 0x144   : > { %1084 = vmatmul.mubr.msk.bf16.vlgmr.msra.gmra.mxu1 %vm310_vm0, %v1613_v20  ;;  %1090 = vmatmul.mubr.msk.bf16.vlgmr.msra.gmra.mxu0 %vm310_vm0, %v1613_v20 }
 0x145   : > { %1094 = vmatpush3.bf16.msra.mxu1 %v391_v29  ;;  %1100 = vmatpush3.bf16.msra.mxu0 %v1206_v0 }
 0x146   : > { %1101 = vmatprep.mubr.msk.bf16.mxu0 %vm310_vm0, %v588_v28  ;;  %1095 = vmatprep.mubr.msk.bf16.mxu1 %vm1373_vm1, %v1372_v13 }
 0x147   : > { %1109 = vmatprep.subr.bf16.mxu1 %v1372_v13  ;;  %1121 = vmatprep.subr.bf16.mxu0 %v1372_v13 }
 0x14c   : > { %1102 = vmatmul.mubr.msk.bf16.vlgmr.msra.gmra.mxu0 %vm310_vm0, %v589_v34  ;;  %1096 = vmatmul.mubr.msk.bf16.vlgmr.msra.gmra.mxu1 %vm310_vm0, %v1613_v20 }
 0x14d   : > { %1105 = vmatprep.mubr.msk.bf16.mxu0 %vm310_vm0, %v590_v35  ;;  %1111 = vmatprep.mubr.msk.bf16.mxu1 %vm1373_vm1, %v1372_v13 }
 0x154   : > { %1106 = vmatmul.mubr.msk.bf16.gmra.mxu0 %vm310_vm0, %v591_v38 }
 0x155   : > { %1123 = vmatprep.mubr.msk.bf16.mxu0 %vm1373_vm1, %v1372_v13 }
 0x1fc   : > { %v434_v39 = vpop.f32.mrf.mxu1 }
 0x1fd   : > { %v564_v9 = vmul.f32 %v434_v39, %v1579_v1 }
 0x1fe   : > { %v1079_v40 = vpop.f32.mrf.mxu1 }
 0x1ff   : > { %v572_v16 = vsub.f32 %v1579_v1, %v564_v9 }
 0x200   : > { %v437_v41 = vpop.f32.mrf.mxu1 }
 0x201   : > { %v565_v17 = vmul.f32 %v437_v41, %v1581_v2 }
 0x202   : > { %v1080_v42 = vpop.f32.mrf.mxu1 }
 0x204   : > { %v516_v43 = vpop.f32.mrf.mxu0  ;;  %v475_v44 = vpop.f32.mrf.mxu1 }
 0x205   : > { %v568_v25 = vmul.f32 %v516_v43, %v1589_v6 }
 0x206   : > { %v1091_v45 = vpop.f32.mrf.mxu0  ;;  %v1085_v46 = vpop.f32.mrf.mxu1 }
 0x207   : > { %v576_v43 = vsub.f32 %v1589_v6, %v568_v25 }
 0x208   : > { %v519_v47 = vpop.f32.mrf.mxu0  ;;  %v478_v48 = vpop.f32.mrf.mxu1 }
 0x209   : > { %v567_v41 = vmul.f32 %v478_v48, %v1587_v5 }
 0x20a   : > { %v1092_v49 = vpop.f32.mrf.mxu0  ;;  %v1086_v50 = vpop.f32.mrf.mxu1 }
 0x20b   : > { %v575_v6 = vsub.f32 %v1587_v5, %v567_v41 }
 0x20c   : > { %v1103_v51 = vpop.f32.mrf.mxu0  ;;  %v1671_v52 = vpop.f32.mrf.mxu1 }
 0x20d   : > { %v570_v48 = vmul.f32 %v1671_v52, %v1600_v10 }
 0x20e   : > { %v638_v53 = vpop.f32.mrf.mxu0  ;;  %v1097_v54 = vpop.f32.mrf.mxu1 }
 0x210   : > { %v1104_v55 = vpop.f32.mrf.mxu0  ;;  %v1673_v56 = vpop.f32.mrf.mxu1 }
 0x211   : > { %v670_v62 = vpack.c.bf16 %v1104_v55, %v1103_v51  ;;  %v571_v5 = vmul.f32 %v1673_v56, %v1602_v11 }
 0x212   : > { %v641_v57 = vpop.f32.mrf.mxu0  ;;  %v1098_v58 = vpop.f32.mrf.mxu1 }
 0x213   : > { %v669_v59 = vpack.c.bf16 %v641_v57, %v638_v53 }
 0x214   : > { %v1107_v60 = vpop.f32.mrf.mxu0 }
 0x215   : > { %1110 = vmatpush3.bf16.msra.mxu1 %v669_v59 }
 0x216   : > { %v654_v61 = vpop.f32.mrf.mxu0  ;;  %1115 = vmatprep.subr.bf16.mxu1 %v1372_v13 }
 0x218   : > { %v1108_v63 = vpop.f32.mrf.mxu0  ;;  %1112 = vmatmul.mubr.msk.bf16.vlgmr.msra.gmra.mxu1 %vm310_vm0, %v1613_v20 }
 0x219   : > { %1116 = vmatpush3.bf16.msra.mxu1 %v670_v62  ;;  %1117 = vmatprep.mubr.msk.bf16.mxu1 %vm1373_vm1, %v1372_v13  ;;  %v672_v8 = vpack.c.bf16 %v1108_v63, %v1107_v60  ;;  %v578_v63 = vsub.f32 %v1600_v10, %v570_v48  ;;  %v579_v10 = vsub.f32 %v1602_v11, %v571_v5 }
 0x21a   : > { %v657_v0 = vpop.f32.mrf.mxu0  ;;  %1127 = vmatprep.subr.bf16.mxu1 %v1372_v13 }
 0x21b   : > { %v671_v4 = vpack.c.bf16 %v657_v0, %v654_v61 }
 0x21d   : > { %1122 = vmatpush3.bf16.msra.mxu0 %v671_v4 }
 0x220   : > { %1118 = vmatmul.mubr.msk.bf16.vlgmr.msra.gmra.mxu1 %vm310_vm0, %v1613_v20  ;;  %1124 = vmatmul.mubr.msk.bf16.vlgmr.msra.gmra.mxu0 %vm310_vm0, %v1613_v20 }
 0x221   : > { %1128 = vmatpush3.bf16.msra.mxu1 %v672_v8  ;;  %1129 = vmatprep.mubr.msk.bf16.mxu1 %vm1373_vm1, %v1372_v13  ;;  %v566_v13 = vmul.f32 %v475_v44, %v1583_v3  ;;  %v569_v44 = vmul.f32 %v519_v47, %v1591_v7 }
 0x223   : > { %v574_v38 = vsub.f32 %v1583_v3, %v566_v13  ;;  %v577_v58 = vsub.f32 %v1591_v7, %v569_v44 }
 0x228   : > { %1130 = vmatmul.mubr.msk.bf16.vlgmr.msra.gmra.mxu1 %vm310_vm0, %v1613_v20  ;;  %v573_v20 = vsub.f32 %v1581_v2, %v565_v17 }
 0x2d8   : > { %v707_v12 = vpop.f32.mrf.mxu1 }
 0x2d9   : > { %v837_v14 = vmul.f32 %v707_v12, %v1622_v26 }
 0x2da   : > { %v1113_v15 = vpop.f32.mrf.mxu1 }
 0x2db   : > { %v845_v18 = vsub.f32 %v1622_v26, %v837_v14 }
 0x2dc   : > { %v710_v19 = vpop.f32.mrf.mxu1 }
 0x2dd   : > { %v853_v21 = vsub.f32 %v572_v16, %v845_v18  ;;  %v838_v22 = vmul.f32 %v710_v19, %v1625_v27 }
 0x2de   : > { %v1114_v23 = vpop.f32.mrf.mxu1 }
 0x2df   : > { %v846_v24 = vsub.f32 %v1625_v27, %v838_v22  ;;  %v861_v1 = vand.u32 2147483647, %v853_v21 }
 0x2e0   : > { %v748_v28 = vpop.f32.mrf.mxu1  ;;  %v789_v29 = vpop.f32.mrf.mxu0 }
 0x2e1   : > { %v854_v34 = vsub.f32 %v573_v20, %v846_v24  ;;  %v839_v35 = vmul.f32 %v748_v28, %v1634_v30  ;;  %v841_v26 = vmul.f32 %v789_v29, %v1641_v32  ;;  %v869_v49 = vsel %vm310_vm0, %v861_v1, 0.0 }
 0x2e2   : > { %v1119_v39 = vpop.f32.mrf.mxu1  ;;  %v1125_v40 = vpop.f32.mrf.mxu0 }
 0x2e3   : > { %v862_v42 = vand.u32 2147483647, %v854_v34  ;;  %v847_v2 = vsub.f32 %v1634_v30, %v839_v35  ;;  %v849_v27 = vsub.f32 %v1641_v32, %v841_v26 }
 0x2e4   : > { %v751_v45 = vpop.f32.mrf.mxu1  ;;  %v792_v46 = vpop.f32.mrf.mxu0 }
 0x2e5   : > { %v870_v50 = vsel %vm310_vm0, %v862_v42, 0.0  ;;  %v855_v3 = vsub.f32 %v574_v38, %v847_v2  ;;  %v840_v51 = vmul.f32 %v751_v45, %v1637_v31  ;;  %v842_v30 = vmul.f32 %v792_v46, %v1644_v33 }
 0x2e6   : > { %v871_v53 = vadd.f32 %v870_v50, %v869_v49  ;;  %v1120_v32 = vpop.f32.mrf.mxu1  ;;  %v1126_v54 = vpop.f32.mrf.mxu0  ;;  %v857_v55 = vsub.f32 %v576_v43, %v849_v27 }
 0x2e7   : > { %v863_v47 = vand.u32 2147483647, %v855_v3  ;;  %v848_v57 = vsub.f32 %v1637_v31, %v840_v51  ;;  %v850_v59 = vsub.f32 %v1644_v33, %v842_v30 }
 0x2e8   : > { %v830_v60 = vpop.f32.mrf.mxu1  ;;  %v865_v9 = vand.u32 2147483647, %v857_v55 }
 0x2e9   : > { %v872_v61 = vsel %vm310_vm0, %v863_v47, 0.0  ;;  %v856_v62 = vsub.f32 %v575_v6, %v848_v57  ;;  %v843_v52 = vmul.f32 %v830_v60, %v1659_v36  ;;  %v858_v4 = vsub.f32 %v577_v58, %v850_v59 }
 0x2ea   : > { %v873_v0 = vadd.f32 %v872_v61, %v871_v53  ;;  %v1131_v8 = vpop.f32.mrf.mxu1  ;;  %v876_v56 = vsel %vm310_vm0, %v865_v9, 0.0 }
 0x2eb   : > { %v864_v31 = vand.u32 2147483647, %v856_v62  ;;  %v851_v7 = vsub.f32 %v1659_v36, %v843_v52  ;;  %v866_v14 = vand.u32 2147483647, %v858_v4 }
 0x2ec   : > { %v833_v12 = vpop.f32.mrf.mxu1 }
 0x2ed   : > { %v874_v33 = vsel %vm310_vm0, %v864_v31, 0.0  ;;  %v859_v15 = vsub.f32 %v578_v63, %v851_v7  ;;  %v844_v16 = vmul.f32 %v833_v12, %v1662_v37  ;;  %v878_v36 = vsel %vm310_vm0, %v866_v14, 0.0 }
 0x2ee   : > { %v1132_v17 = vpop.f32.mrf.mxu1  ;;  %v875_v18 = vadd.f32 %v874_v33, %v873_v0 }
 0x2ef   : > { %v852_v19 = vsub.f32 %v1662_v37, %v844_v16  ;;  %v867_v21 = vand.u32 2147483647, %v859_v15 }
 0x2f0   : > { %v877_v22 = vadd.f32 %v876_v56, %v875_v18 }
 0x2f1   : > { %v860_v13 = vsub.f32 %v579_v10, %v852_v19  ;;  %v880_v24 = vsel %vm310_vm0, %v867_v21, 0.0 }
 0x2f2   : > { %v879_v23 = vadd.f32 %v878_v36, %v877_v22 }
 0x2f3   : > { %v868_v20 = vand.u32 2147483647, %v860_v13 }
 0x2f4   : > { %v881_v25 = vadd.f32 %v880_v24, %v879_v23 }
 0x2f5   : > { %v882_v28 = vsel %vm310_vm0, %v868_v20, 0.0 }
 0x2f6   : > { %v883_v29 = vadd.f32 %v882_v28, %v881_v25 }
 0x2f8   : > { %884 = vadd.xlane.f32.xlu0 %v883_v29 }
 0x381   : > { %v885_v11 = vpop.xlane.xlu0 %884 }
 0x382   : > { %v886_v37 = vrot.slane %v885_v11, 4 }
 0x384   : > { %v887_v1 = vadd.f32 %v886_v37, %v885_v11 }
 0x386   : > { %v888_v34 = vrot.slane %v887_v1, 2 }
 0x388   : > { %v889_v35 = vadd.f32 %v888_v34, %v887_v1 }
 0x38a   : > { %v890_v26 = vrot.slane %v889_v35, 1 }
 0x38c   : > { %v891_v38 = vadd.f32 %v890_v26, %v889_v35 }
 0x38e   : > { %1133 = vpush %v891_v38 }
 0x3bf   : > { %s1134_s25 = spop %1133 }
 0x3c0   : > { %v893_v39 = vstv %s1134_s25 }
 0x3c1   : > { %895 = vst.msk [vmem:[%s286_s23] sm:$0x1] %vm894_vm2, %v893_v39 }
 0x3c2 PF: > { %p18_p0 = scmp.ge.s32.totalorder %s1461_s9, 4   ;;  %s1765_s15 = smov %s1354_s16 }
 0x3c3   : > { %s1766_s16 = smov %s1358_s17  ;;  %s1767_s17 = smov %s1472_s13 }
 0x3c4   : > { %s1768_s18 = smov %s1461_s9  ;;  %20 = sbr.rel (!%p18_p0) target bundleno = 6 (0x6), region = 97 }
 0x3c9   :  { %913 = vsyncpa [#allocation3], 1 }
 0x3ca   :  { %915 = vsyncpa [#allocation3 + $0x1], 1 }
 0x3cb   :  { %916 = vsyncpa [#allocation5], 1 }
 0x3cc   :  { %918 = vsyncpa [#allocation5 + $0x1], 1 }
 0x3cd   :  { %919 = vsyncpa [#allocation8], 1 }

// kernel: tpu_custom_call.1
= control target key start
LH: loop header
LB: loop body
LE: loop exit
PB: predicated region body
PF: predicated region fallthrough
CT: control target
= control target key end

     0   :  { %9 = vsyncpa [#allocation3], 0  ;;  %s1749_s0 = inlined_call_operand.hbm [shape: f32[8,16,16], index: 0, kind: input, shape index: {}]   ;;  %s1750_s1 = inlined_call_operand.hbm [shape: f32[8,16,16], index: 1, kind: input, shape index: {}]   ;;  %s1751_s2 = inlined_call_operand.hbm [shape: bf16[16,16], index: 2, kind: input, shape index: {}]   ;;  %s1752_s3 = inlined_call_operand.hbm [shape: bf16[16,16], index: 3, kind: input, shape index: {}]   ;;  %s1753_s4 = inlined_call_operand.vmem [shape: f32[2,1,1], index: 4, kind: output, shape index: {}]  }
   0x1   :  { %11 = vsyncpa [#allocation3 + $0x1], 0 }
   0x2   :  { %12 = vsyncpa [#allocation5], 0 }
   0x3   :  { %14 = vsyncpa [#allocation5 + $0x1], 0 }
   0x4   :  { %15 = vsyncpa [#allocation8], 0  ;;  %s1399_s15 = smov 0   ;;  %s1401_s16 = smov 0  }
   0x5   :  { %s1403_s17 = smov 0   ;;  %s1405_s18 = smov 0  }
   0x6 LB: > { %s1418_s19 = sadd.s32 4294967295, %s1362_s18   ;;  %p41_p0 = scmp.ne.s32.totalorder %s1354_s16, %s1350_s15  ;;  %s1362_s18 = sphi %s1405_s18, %s1768_s18   ;;  %s1358_s17 = sphi %s1403_s17, %s1767_s17   ;;  %s1354_s16 = sphi %s1401_s16, %s1766_s16   ;;  %s1350_s15 = sphi %s1399_s15, %s1765_s15  }
   0x7   : > { %p1754_p1 = scmp.eq.s32.totalorder %s1418_s19, 0  ;;  %p998_p2 = scmp.ge.s32.totalorder %s1362_s18, 1 }
   0x8   : > { %p146_p3 = scmp.lt.s32.totalorder %s1362_s18, 3  ;;  %s1364_s22 = smov [#allocation6]  }
   0x9   : > { %p1426_p4 = por %p1754_p1, %p41_p0  ;;  %s158_s23 = sshll.u32 %s1364_s22, 4  ;;  %s159_s23 = int_to_ptr.vmem [resolvable:$true] %s158_s23 }
   0xa   : > { %p1430_p5 = pnand %p998_p2, %p146_p3  ;;  %s1365_s25 = smov [#allocation7]  }
   0xb   : > { %s1756_s20 = scalar_select %p1426_p4, 1, 0 }
   0xc   : > { %p1147_p6 = pneg %p1430_p5  ;;  %s171_s26 = sshll.u32 %s1365_s25, 4  ;;  %s172_s26 = int_to_ptr.vmem [resolvable:$true] %s171_s26 }
   0xd   : > { %s1219_s27 = scalar_lea.vmem %s159_s23, 128  ;;  %p1227_p12 = scmp.lt.s32.totalorder %s159_s23, %s159_s23 }
   0xe   : > { %p1438_p7 = pnand %p1147_p6, %p1754_p1  ;;  %p1220_p9 = scmp.ne.s32.totalorder %s159_s23, %s1219_s27 }
   0xf   : > { %p1228_p13 = scmp.lt.s32.totalorder %s1219_s27, %s1219_s27 }
  0x10   : > { %p1210_p8 = pneg %p1438_p7 }
  0x11   : > { %p1229_p0 = por %p1228_p13, %p1227_p12 }
  0x12   : > { %p1222_p10 = pnand %p1220_p9, %p1210_p8 }
  0x14   : > { %p1223_p11 = pneg %p1222_p10 }
  0x16   : > { %p1230_p2 = pnand %p1229_p0, %p1223_p11 }
  0x18   : > { %1233 = shalt.err (!%p1230_p2)
}
  0x19   : > { %s1366_s28 = smov 64   ;;  %s1367_s29 = smov 4  }
  0x1a   : > { %1150 = dma.hbm_to_vmem [thread:$0]  (!%p1438_p7), %s1751_s2, 128, %s159_s23, [#allocation5], %s1366_s28, %s1366_s28, %s1367_s29  }
  0x1b   : > { %s1245_s6 = scalar_lea.vmem %s172_s26, 128  ;;  %p1253_p10 = scmp.lt.s32.totalorder %s172_s26, %s172_s26 }
  0x1c   : > { %p1246_p3 = scmp.ne.s32.totalorder %s172_s26, %s1245_s6  ;;  %p1254_p1 = scmp.lt.s32.totalorder %s1245_s6, %s1245_s6 }
  0x1e   : > { %p1248_p6 = pnand %p1246_p3, %p1210_p8  ;;  %p1255_p12 = por %p1254_p1, %p1253_p10 }
  0x20   : > { %p1249_p9 = pneg %p1248_p6 }
  0x22   : > { %p1256_p11 = pnand %p1255_p12, %p1249_p9 }
  0x24   : > { %1259 = shalt.err (!%p1256_p11)
}
  0x25   : > { %1153 = dma.hbm_to_vmem [thread:$0]  (!%p1438_p7), %s1752_s3, 128, %s172_s26, [#allocation8], %s1366_s28, %s1366_s28, %s1367_s29  }
  0x26   : > { %s1461_s9 = sadd.s32 1, %s1362_s18   ;;  %s28_s10 = sadd.s32 1, %s1358_s17 }
  0x27   : > { %s25_s11 = ssub.s32 %s1362_s18, %s1461_s9  ;;  %p35_p1 = scmp.ne.s32.totalorder %s1358_s17, %s1354_s16 }
  0x28   : > { %p26_p8 = scmp.eq.s32.totalorder %s25_s11, 0  ;;  %p36_p13 = scmp.eq.s32.totalorder %s1362_s18, 0 }
  0x29   : > { %p1163_p0 = scmp.lt.s32.totalorder %s1362_s18, 2  ;;  %s185_s12 = sand.u32 1, %s1358_s17  }
  0x2a   : > { %s1472_s13 = scalar_select %p26_p8, %s1358_s17, %s28_s10  }
  0x2b   : > { %p37_p2 = por %p36_p13, %p35_p1  ;;  %s1474_s14 = sshll.u32 %s185_s12, 6 }
  0x2c   : > { %s1036_s15 = sshll.u32 %s1362_s18, 10  ;;  %s189_s25 = scalar_lea.vmem [#allocation2], %s1474_s14 }
  0x2d   : > { %s1482_s24 = scalar_lea.hbm %s1749_s0, %s1036_s15  ;;  %s197_s26 = sshll.u32 %s189_s25, 4  ;;  %s1489_s26 = int_to_ptr.vmem [resolvable:$true] %s197_s26 }
  0x2e   : > { %p1485_p7 = pnand %p1163_p0, %p37_p2  ;;  %s1491_s28 = scalar_lea.sflag [#allocation3], %s185_s12 }
  0x2f   : > { %s1260_s29 = scalar_lea.hbm %s1482_s24, 1024  ;;  %s1265_s6 = scalar_lea.hbm %s1749_s0, 2048 }
  0x30   : > { %p1261_p3 = scmp.ne.s32.totalorder %s1482_s24, %s1260_s29  ;;  %p1262_p6 = pneg %p1485_p7 }
  0x31   : > { %p1266_p12 = scmp.lt.s32.totalorder %s1482_s24, %s1749_s0  ;;  %p1267_p11 = scmp.lt.s32.totalorder %s1265_s6, %s1260_s29 }
  0x32   : > { %p1263_p9 = pnand %p1262_p6, %p1261_p3 }
  0x33   : > { %p1268_p1 = por %p1267_p11, %p1266_p12 }
  0x34   : > { %p1264_p10 = pneg %p1263_p9 }
  0x36   : > { %p1269_p8 = pnand %p1268_p1, %p1264_p10 }
  0x38   : > { %1272 = shalt.err (!%p1269_p8)
}
  0x39   : > { %s1273_s10 = scalar_lea.vmem %s1489_s26, 1024  ;;  %s1368_s11 = smov [#allocation2]  }
  0x3a   : > { %p1274_p13 = scmp.ne.s32.totalorder %s1489_s26, %s1273_s10  ;;  %s1278_s12 = sshll.u32 %s1368_s11, 4  ;;  %s1279_s12 = int_to_ptr.vmem [resolvable:$false] %s1278_s12 }
  0x3b   : > { %s1280_s22 = scalar_lea.vmem %s1279_s12, 2048  ;;  %p1281_p3 = scmp.lt.s32.totalorder %s1489_s26, %s1279_s12 }
  0x3c   : > { %p1276_p0 = pnand %p1274_p13, %p1262_p6  ;;  %p1282_p9 = scmp.lt.s32.totalorder %s1280_s22, %s1273_s10 }
  0x3e   : > { %p1277_p2 = pneg %p1276_p0  ;;  %p1283_p4 = por %p1282_p9, %p1281_p3 }
  0x40   : > { %p1284_p12 = pnand %p1283_p4, %p1277_p2 }
  0x42   : > { %1287 = shalt.err (!%p1284_p12)
}
  0x43   : > { %s1369_s23 = smov 128   ;;  %s1370_s25 = smov 8  }
  0x44   : > { %1157 = dma.hbm_to_vmem [thread:$0]  (!%p1485_p7), %s1482_s24, 1024, %s1489_s26, %s1491_s28, %s1369_s23, %s1369_s23, %s1370_s25  }
  0x45   : > { %s1526_s5 = scalar_lea.hbm %s1750_s1, %s1036_s15  ;;  %s211_s6 = scalar_lea.vmem [#allocation4], %s1474_s14 }
  0x46   : > { %s219_s7 = sshll.u32 %s211_s6, 4  ;;  %s207_s8 = sand.u32 1, %s1362_s18   ;;  %s1530_s7 = int_to_ptr.vmem [resolvable:$true] %s219_s7 }
  0x47   : > { %s208_s10 = scalar_lea.sflag [#allocation5], %s207_s8  ;;  %s1288_s11 = scalar_lea.hbm %s1526_s5, 1024 }
  0x48   : > { %p1289_p4 = scmp.ne.s32.totalorder %s1526_s5, %s1288_s11  ;;  %s1293_s15 = scalar_lea.hbm %s1750_s1, 2048 }
  0x49   : > { %p1294_p1 = scmp.lt.s32.totalorder %s1526_s5, %s1750_s1  ;;  %p1295_p8 = scmp.lt.s32.totalorder %s1293_s15, %s1288_s11 }
  0x4a   : > { %p1291_p10 = pnand %p1289_p4, %p1262_p6 }
  0x4b   : > { %p1296_p13 = por %p1295_p8, %p1294_p1 }
  0x4c   : > { %p1292_p11 = pneg %p1291_p10 }
  0x4e   : > { %p1297_p0 = pnand %p1296_p13, %p1292_p11 }
  0x50   : > { %1300 = shalt.err (!%p1297_p0)
}
  0x51   : > { %s1301_s18 = scalar_lea.vmem %s1530_s7, 1024  ;;  %s1371_s14 = smov [#allocation4]  }
  0x52   : > { %p1302_p2 = scmp.ne.s32.totalorder %s1530_s7, %s1301_s18  ;;  %s1306_s22 = sshll.u32 %s1371_s14, 4  ;;  %s1307_s22 = int_to_ptr.vmem [resolvable:$false] %s1306_s22 }
  0x53   : > { %s1308_s29 = scalar_lea.vmem %s1307_s22, 2048  ;;  %p1309_p12 = scmp.lt.s32.totalorder %s1530_s7, %s1307_s22 }
  0x54   : > { %p1304_p3 = pnand %p1302_p2, %p1262_p6  ;;  %p1310_p4 = scmp.lt.s32.totalorder %s1308_s29, %s1301_s18 }
  0x56   : > { %p1305_p9 = pneg %p1304_p3  ;;  %p1311_p10 = por %p1310_p4, %p1309_p12 }
  0x58   : > { %p1312_p1 = pnand %p1311_p10, %p1305_p9 }
  0x5a   : > { %1315 = shalt.err (!%p1312_p1)
}
  0x5b   : > { %1160 = dma.hbm_to_vmem [thread:$0]  (!%p1485_p7), %s1526_s5, 1024, %s1530_s7, %s208_s10, %s1369_s23, %s1369_s23, %s1370_s25  }
  0x5c   : > { %231 = sbr.rel (%p1430_p5) target bundleno = 962 (0x3c2), region = 36  ;;  %s233_s30 = sand.u32 (!%p1430_p5), 1, %s1354_s16  }
  0x5d   : > { %s1011_s6 = sshll.u32 (!%p1430_p5), %s233_s30, 6  ;;  %s234_s8 = scalar_lea.sflag (!%p1430_p5), [#allocation3], %s233_s30 }
  0x5e   : > { %s237_s11 = scalar_lea.vmem (!%p1430_p5), [#allocation2], %s1011_s6  ;;  %p1760_p6 = scmp.ne.s32.totalorder (!%p1430_p5), %s1756_s20, 0 }
  0x61   : > { %1333 = dma.done.wait (%p1760_p6), %s234_s8, 1024  }
  0x62   : > { %1335 = vsyncadd (%p1760_p6), %s234_s8, 4294966272  ;;  %s242_s27 = sand.u32 1, %s1418_s19   ;;  %s1565_s26 = scalar_lea.vmem [#allocation4], %s1011_s6 }
  0x63   : > { %s243_s24 = scalar_lea.sflag [#allocation5], %s242_s27 }
  0x64   : > { %1337 = dma.done.wait (%p1760_p6), %s243_s24, 1024  }
  0x65   : > { %1339 = vsyncadd (%p1760_p6), %s243_s24, 4294966272  ;;  %p1761_p5 = scmp.eq.s32.totalorder %s1418_s19, 0 }
  0x67   : > { %1341 = dma.done.wait (%p1761_p5), [#allocation5], 128   ;;  %p1762_p7 = pmov %p1761_p5 }
  0x68   : > { %p1763_p11 = pmov %p1761_p5 }
  0x69   : > { %1343 = vsyncadd (%p1762_p7), [#allocation5], 4294967168 }
  0x6a   : > { %1345 = dma.done.wait (%p1763_p11), [#allocation8], 128   ;;  %p1764_p8 = pmov %p1761_p5 }
  0x6b   : > { %v1206_v0 = vld [vmem:[#allocation7] sm:$0xff]   ;;  %v1579_v1 = vld [vmem:[%s237_s11] sm:$0xff]  ;;  %vm310_vm0 = vcmask 130048   ;;  %v1583_v3 = vld [vmem:[%s237_s11 + $0x10] sm:$0xff]  ;;  %v1372_v13 = vmov 0.0   ;;  %vm1373_vm1 = vmmov 0  }
  0x6c   : > { %1347 = vsyncadd (%p1764_p8), [#allocation8], 4294967168  ;;  %v1581_v2 = vld [vmem:[%s237_s11 + $0x8] sm:$0xff]  ;;  %1065 = vmatprep.subr.bf16.mxu0 %v1206_v0  ;;  %v1587_v5 = vld [vmem:[%s237_s11 + $0x18] sm:$0xff]  ;;  %1075 = vmatprep.subr.bf16.mxu1 %v1372_v13  ;;  %p284_p13 = scmp.lt.s32.totalorder %s1418_s19, 1  ;;  %vm894_vm2 = vcmask 0  }
  0x6d   : > { %v300_v4 = vpack.c.bf16 %v1581_v2, %v1579_v1  ;;  %v1589_v6 = vld [vmem:[%s237_s11 + $0x20] sm:$0xff]  ;;  %v1591_v7 = vld [vmem:[%s237_s11 + $0x28] sm:$0xff]  ;;  %1066 = vmatpush3.bf16.msra.mxu0 %v1206_v0  ;;  %v301_v8 = vpack.c.bf16 %v1587_v5, %v1583_v3  ;;  %v1600_v10 = vld [vmem:[%s237_s11 + $0x30] sm:$0xff]  ;;  %1077 = vmatprep.mubr.msk.bf16.mxu1 %vm1373_vm1, %v1372_v13 }
  0x6e   : > { %v302_v9 = vpack.c.bf16 %v1591_v7, %v1589_v6  ;;  %v1602_v11 = vld [vmem:[%s237_s11 + $0x38] sm:$0xff]  ;;  %1087 = vmatprep.subr.bf16.mxu0 %v1372_v13  ;;  %v1613_v20 = vld [vmem:[#allocation6] sm:$0xff]   ;;  %v1625_v27 = vld [vmem:[%s1565_s26 + $0x8] sm:$0xff]  ;;  %s1770_s19 = smov (!%p284_p13, %s1418_s19), 1 }
  0x6f   : > { %1067 = vmatprep.mubr.msk.bf16.mxu0 %vm310_vm0, %v300_v4  ;;  %v303_v12 = vpack.c.bf16 %v1602_v11, %v1600_v10  ;;  %v1622_v26 = vld [vmem:[%s1565_s26] sm:$0xff]  ;;  %v1634_v30 = vld [vmem:[%s1565_s26 + $0x10] sm:$0xff]  ;;  %v1637_v31 = vld [vmem:[%s1565_s26 + $0x18] sm:$0xff]  ;;  %s286_s23 = scalar_lea.vmem %s1753_s4, %s1770_s19 }
  0x70   : > { %1068 = vmatmul.mubr.msk.bf16.vlgmr.msra.gmra.mxu0 %vm310_vm0, %v301_v8  ;;  %v588_v28 = vpack.c.bf16 %v1625_v27, %v1622_v26  ;;  %v1641_v32 = vld [vmem:[%s1565_s26 + $0x20] sm:$0xff]  ;;  %v1644_v33 = vld [vmem:[%s1565_s26 + $0x28] sm:$0xff]  ;;  %v589_v34 = vpack.c.bf16 %v1637_v31, %v1634_v30  ;;  %v1659_v36 = vld [vmem:[%s1565_s26 + $0x30] sm:$0xff] }
  0x71   : > { %1071 = vmatprep.mubr.msk.bf16.mxu0 %vm310_vm0, %v302_v9  ;;  %v590_v35 = vpack.c.bf16 %v1644_v33, %v1641_v32  ;;  %v1662_v37 = vld [vmem:[%s1565_s26 + $0x38] sm:$0xff] }
  0x72   : > { %v591_v38 = vpack.c.bf16 %v1662_v37, %v1659_v36 }
  0x78   : > { %1072 = vmatmul.mubr.msk.bf16.gmra.mxu0 %vm310_vm0, %v303_v12 }
  0x79   : > { %1089 = vmatprep.mubr.msk.bf16.mxu0 %vm1373_vm1, %v1372_v13 }
 0x130   : > { %v1069_v14 = vpop.f32.mrf.mxu0 }
 0x132   : > { %v357_v15 = vpop.f32.mrf.mxu0 }
 0x134   : > { %v1070_v16 = vpop.f32.mrf.mxu0 }
 0x135   : > { %v389_v22 = vpack.c.bf16 %v1070_v16, %v1069_v14 }
 0x136   : > { %v360_v17 = vpop.f32.mrf.mxu0 }
 0x137   : > { %v388_v18 = vpack.c.bf16 %v360_v17, %v357_v15 }
 0x138   : > { %v1073_v19 = vpop.f32.mrf.mxu0 }
 0x139   : > { %1076 = vmatpush3.bf16.msra.mxu1 %v388_v18 }
 0x13a   : > { %v373_v21 = vpop.f32.mrf.mxu0  ;;  %1081 = vmatprep.subr.bf16.mxu1 %v1372_v13 }
 0x13c   : > { %v1074_v23 = vpop.f32.mrf.mxu0  ;;  %1078 = vmatmul.mubr.msk.bf16.vlgmr.msra.gmra.mxu1 %vm310_vm0, %v1613_v20 }
 0x13d   : > { %1082 = vmatpush3.bf16.msra.mxu1 %v389_v22  ;;  %1083 = vmatprep.mubr.msk.bf16.mxu1 %vm1373_vm1, %v1372_v13  ;;  %v391_v29 = vpack.c.bf16 %v1074_v23, %v1073_v19 }
 0x13e   : > { %v376_v24 = vpop.f32.mrf.mxu0  ;;  %1093 = vmatprep.subr.bf16.mxu1 %v1372_v13 }
 0x13f   : > { %v390_v25 = vpack.c.bf16 %v376_v24, %v373_v21 }
 0x141   : > { %1088 = vmatpush3.bf16.msra.mxu0 %v390_v25 }
 0x142   : > { %1099 = vmatprep.subr.bf16.mxu0 %v1206_v0 }
 0x144   : > { %1084 = vmatmul.mubr.msk.bf16.vlgmr.msra.gmra.mxu1 %vm310_vm0, %v1613_v20  ;;  %1090 = vmatmul.mubr.msk.bf16.vlgmr.msra.gmra.mxu0 %vm310_vm0, %v1613_v20 }
 0x145   : > { %1094 = vmatpush3.bf16.msra.mxu1 %v391_v29  ;;  %1100 = vmatpush3.bf16.msra.mxu0 %v1206_v0 }
 0x146   : > { %1101 = vmatprep.mubr.msk.bf16.mxu0 %vm310_vm0, %v588_v28  ;;  %1095 = vmatprep.mubr.msk.bf16.mxu1 %vm1373_vm1, %v1372_v13 }
 0x147   : > { %1109 = vmatprep.subr.bf16.mxu1 %v1372_v13  ;;  %1121 = vmatprep.subr.bf16.mxu0 %v1372_v13 }
 0x14c   : > { %1102 = vmatmul.mubr.msk.bf16.vlgmr.msra.gmra.mxu0 %vm310_vm0, %v589_v34  ;;  %1096 = vmatmul.mubr.msk.bf16.vlgmr.msra.gmra.mxu1 %vm310_vm0, %v1613_v20 }
 0x14d   : > { %1105 = vmatprep.mubr.msk.bf16.mxu0 %vm310_vm0, %v590_v35  ;;  %1111 = vmatprep.mubr.msk.bf16.mxu1 %vm1373_vm1, %v1372_v13 }
 0x154   : > { %1106 = vmatmul.mubr.msk.bf16.gmra.mxu0 %vm310_vm0, %v591_v38 }
 0x155   : > { %1123 = vmatprep.mubr.msk.bf16.mxu0 %vm1373_vm1, %v1372_v13 }
 0x1fc   : > { %v434_v39 = vpop.f32.mrf.mxu1 }
 0x1fd   : > { %v564_v9 = vmul.f32 %v434_v39, %v1579_v1 }
 0x1fe   : > { %v1079_v40 = vpop.f32.mrf.mxu1 }
 0x1ff   : > { %v572_v16 = vsub.f32 %v1579_v1, %v564_v9 }
 0x200   : > { %v437_v41 = vpop.f32.mrf.mxu1 }
 0x201   : > { %v565_v17 = vmul.f32 %v437_v41, %v1581_v2 }
 0x202   : > { %v1080_v42 = vpop.f32.mrf.mxu1 }
 0x204   : > { %v516_v43 = vpop.f32.mrf.mxu0  ;;  %v475_v44 = vpop.f32.mrf.mxu1 }
 0x205   : > { %v568_v25 = vmul.f32 %v516_v43, %v1589_v6 }
 0x206   : > { %v1091_v45 = vpop.f32.mrf.mxu0  ;;  %v1085_v46 = vpop.f32.mrf.mxu1 }
 0x207   : > { %v576_v43 = vsub.f32 %v1589_v6, %v568_v25 }
 0x208   : > { %v519_v47 = vpop.f32.mrf.mxu0  ;;  %v478_v48 = vpop.f32.mrf.mxu1 }
 0x209   : > { %v567_v41 = vmul.f32 %v478_v48, %v1587_v5 }
 0x20a   : > { %v1092_v49 = vpop.f32.mrf.mxu0  ;;  %v1086_v50 = vpop.f32.mrf.mxu1 }
 0x20b   : > { %v575_v6 = vsub.f32 %v1587_v5, %v567_v41 }
 0x20c   : > { %v1103_v51 = vpop.f32.mrf.mxu0  ;;  %v1671_v52 = vpop.f32.mrf.mxu1 }
 0x20d   : > { %v570_v48 = vmul.f32 %v1671_v52, %v1600_v10 }
 0x20e   : > { %v638_v53 = vpop.f32.mrf.mxu0  ;;  %v1097_v54 = vpop.f32.mrf.mxu1 }
 0x210   : > { %v1104_v55 = vpop.f32.mrf.mxu0  ;;  %v1673_v56 = vpop.f32.mrf.mxu1 }
 0x211   : > { %v670_v62 = vpack.c.bf16 %v1104_v55, %v1103_v51  ;;  %v571_v5 = vmul.f32 %v1673_v56, %v1602_v11 }
 0x212   : > { %v641_v57 = vpop.f32.mrf.mxu0  ;;  %v1098_v58 = vpop.f32.mrf.mxu1 }
 0x213   : > { %v669_v59 = vpack.c.bf16 %v641_v57, %v638_v53 }
 0x214   : > { %v1107_v60 = vpop.f32.mrf.mxu0 }
 0x215   : > { %1110 = vmatpush3.bf16.msra.mxu1 %v669_v59 }
 0x216   : > { %v654_v61 = vpop.f32.mrf.mxu0  ;;  %1115 = vmatprep.subr.bf16.mxu1 %v1372_v13 }
 0x218   : > { %v1108_v63 = vpop.f32.mrf.mxu0  ;;  %1112 = vmatmul.mubr.msk.bf16.vlgmr.msra.gmra.mxu1 %vm310_vm0, %v1613_v20 }
 0x219   : > { %1116 = vmatpush3.bf16.msra.mxu1 %v670_v62  ;;  %1117 = vmatprep.mubr.msk.bf16.mxu1 %vm1373_vm1, %v1372_v13  ;;  %v672_v8 = vpack.c.bf16 %v1108_v63, %v1107_v60  ;;  %v578_v63 = vsub.f32 %v1600_v10, %v570_v48  ;;  %v579_v10 = vsub.f32 %v1602_v11, %v571_v5 }
 0x21a   : > { %v657_v0 = vpop.f32.mrf.mxu0  ;;  %1127 = vmatprep.subr.bf16.mxu1 %v1372_v13 }
 0x21b   : > { %v671_v4 = vpack.c.bf16 %v657_v0, %v654_v61 }
 0x21d   : > { %1122 = vmatpush3.bf16.msra.mxu0 %v671_v4 }
 0x220   : > { %1118 = vmatmul.mubr.msk.bf16.vlgmr.msra.gmra.mxu1 %vm310_vm0, %v1613_v20  ;;  %1124 = vmatmul.mubr.msk.bf16.vlgmr.msra.gmra.mxu0 %vm310_vm0, %v1613_v20 }
 0x221   : > { %1128 = vmatpush3.bf16.msra.mxu1 %v672_v8  ;;  %1129 = vmatprep.mubr.msk.bf16.mxu1 %vm1373_vm1, %v1372_v13  ;;  %v566_v13 = vmul.f32 %v475_v44, %v1583_v3  ;;  %v569_v44 = vmul.f32 %v519_v47, %v1591_v7 }
 0x223   : > { %v574_v38 = vsub.f32 %v1583_v3, %v566_v13  ;;  %v577_v58 = vsub.f32 %v1591_v7, %v569_v44 }
 0x228   : > { %1130 = vmatmul.mubr.msk.bf16.vlgmr.msra.gmra.mxu1 %vm310_vm0, %v1613_v20  ;;  %v573_v20 = vsub.f32 %v1581_v2, %v565_v17 }
 0x2d8   : > { %v707_v12 = vpop.f32.mrf.mxu1 }
 0x2d9   : > { %v837_v14 = vmul.f32 %v707_v12, %v1622_v26 }
 0x2da   : > { %v1113_v15 = vpop.f32.mrf.mxu1 }
 0x2db   : > { %v845_v18 = vsub.f32 %v1622_v26, %v837_v14 }
 0x2dc   : > { %v710_v19 = vpop.f32.mrf.mxu1 }
 0x2dd   : > { %v853_v21 = vsub.f32 %v572_v16, %v845_v18  ;;  %v838_v22 = vmul.f32 %v710_v19, %v1625_v27 }
 0x2de   : > { %v1114_v23 = vpop.f32.mrf.mxu1 }
 0x2df   : > { %v846_v24 = vsub.f32 %v1625_v27, %v838_v22  ;;  %v861_v1 = vand.u32 2147483647, %v853_v21 }
 0x2e0   : > { %v748_v28 = vpop.f32.mrf.mxu1  ;;  %v789_v29 = vpop.f32.mrf.mxu0 }
 0x2e1   : > { %v854_v34 = vsub.f32 %v573_v20, %v846_v24  ;;  %v839_v35 = vmul.f32 %v748_v28, %v1634_v30  ;;  %v841_v26 = vmul.f32 %v789_v29, %v1641_v32  ;;  %v869_v49 = vsel %vm310_vm0, %v861_v1, 0.0 }
 0x2e2   : > { %v1119_v39 = vpop.f32.mrf.mxu1  ;;  %v1125_v40 = vpop.f32.mrf.mxu0 }
 0x2e3   : > { %v862_v42 = vand.u32 2147483647, %v854_v34  ;;  %v847_v2 = vsub.f32 %v1634_v30, %v839_v35  ;;  %v849_v27 = vsub.f32 %v1641_v32, %v841_v26 }
 0x2e4   : > { %v751_v45 = vpop.f32.mrf.mxu1  ;;  %v792_v46 = vpop.f32.mrf.mxu0 }
 0x2e5   : > { %v870_v50 = vsel %vm310_vm0, %v862_v42, 0.0  ;;  %v855_v3 = vsub.f32 %v574_v38, %v847_v2  ;;  %v840_v51 = vmul.f32 %v751_v45, %v1637_v31  ;;  %v842_v30 = vmul.f32 %v792_v46, %v1644_v33 }
 0x2e6   : > { %v871_v53 = vadd.f32 %v870_v50, %v869_v49  ;;  %v1120_v32 = vpop.f32.mrf.mxu1  ;;  %v1126_v54 = vpop.f32.mrf.mxu0  ;;  %v857_v55 = vsub.f32 %v576_v43, %v849_v27 }
 0x2e7   : > { %v863_v47 = vand.u32 2147483647, %v855_v3  ;;  %v848_v57 = vsub.f32 %v1637_v31, %v840_v51  ;;  %v850_v59 = vsub.f32 %v1644_v33, %v842_v30 }
 0x2e8   : > { %v830_v60 = vpop.f32.mrf.mxu1  ;;  %v865_v9 = vand.u32 2147483647, %v857_v55 }
 0x2e9   : > { %v872_v61 = vsel %vm310_vm0, %v863_v47, 0.0  ;;  %v856_v62 = vsub.f32 %v575_v6, %v848_v57  ;;  %v843_v52 = vmul.f32 %v830_v60, %v1659_v36  ;;  %v858_v4 = vsub.f32 %v577_v58, %v850_v59 }
 0x2ea   : > { %v873_v0 = vadd.f32 %v872_v61, %v871_v53  ;;  %v1131_v8 = vpop.f32.mrf.mxu1  ;;  %v876_v56 = vsel %vm310_vm0, %v865_v9, 0.0 }
 0x2eb   : > { %v864_v31 = vand.u32 2147483647, %v856_v62  ;;  %v851_v7 = vsub.f32 %v1659_v36, %v843_v52  ;;  %v866_v14 = vand.u32 2147483647, %v858_v4 }
 0x2ec   : > { %v833_v12 = vpop.f32.mrf.mxu1 }
 0x2ed   : > { %v874_v33 = vsel %vm310_vm0, %v864_v31, 0.0  ;;  %v859_v15 = vsub.f32 %v578_v63, %v851_v7  ;;  %v844_v16 = vmul.f32 %v833_v12, %v1662_v37  ;;  %v878_v36 = vsel %vm310_vm0, %v866_v14, 0.0 }
 0x2ee   : > { %v1132_v17 = vpop.f32.mrf.mxu1  ;;  %v875_v18 = vadd.f32 %v874_v33, %v873_v0 }
 0x2ef   : > { %v852_v19 = vsub.f32 %v1662_v37, %v844_v16  ;;  %v867_v21 = vand.u32 2147483647, %v859_v15 }
 0x2f0   : > { %v877_v22 = vadd.f32 %v876_v56, %v875_v18 }
 0x2f1   : > { %v860_v13 = vsub.f32 %v579_v10, %v852_v19  ;;  %v880_v24 = vsel %vm310_vm0, %v867_v21, 0.0 }
 0x2f2   : > { %v879_v23 = vadd.f32 %v878_v36, %v877_v22 }
 0x2f3   : > { %v868_v20 = vand.u32 2147483647, %v860_v13 }
 0x2f4   : > { %v881_v25 = vadd.f32 %v880_v24, %v879_v23 }
 0x2f5   : > { %v882_v28 = vsel %vm310_vm0, %v868_v20, 0.0 }
 0x2f6   : > { %v883_v29 = vadd.f32 %v882_v28, %v881_v25 }
 0x2f8   : > { %884 = vadd.xlane.f32.xlu0 %v883_v29 }
 0x381   : > { %v885_v11 = vpop.xlane.xlu0 %884 }
 0x382   : > { %v886_v37 = vrot.slane %v885_v11, 4 }
 0x384   : > { %v887_v1 = vadd.f32 %v886_v37, %v885_v11 }
 0x386   : > { %v888_v34 = vrot.slane %v887_v1, 2 }
 0x388   : > { %v889_v35 = vadd.f32 %v888_v34, %v887_v1 }
 0x38a   : > { %v890_v26 = vrot.slane %v889_v35, 1 }
 0x38c   : > { %v891_v38 = vadd.f32 %v890_v26, %v889_v35 }
 0x38e   : > { %1133 = vpush %v891_v38 }
 0x3bf   : > { %s1134_s25 = spop %1133 }
 0x3c0   : > { %v893_v39 = vstv %s1134_s25 }
 0x3c1   : > { %895 = vst.msk [vmem:[%s286_s23] sm:$0x1] %vm894_vm2, %v893_v39 }
 0x3c2 PF: > { %p18_p0 = scmp.ge.s32.totalorder %s1461_s9, 4   ;;  %s1765_s15 = smov %s1354_s16 }
 0x3c3   : > { %s1766_s16 = smov %s1358_s17  ;;  %s1767_s17 = smov %s1472_s13 }
 0x3c4   : > { %s1768_s18 = smov %s1461_s9  ;;  %20 = sbr.rel (!%p18_p0) target bundleno = 6 (0x6), region = 97 }
 0x3c9   :  { %913 = vsyncpa [#allocation3], 1 }
 0x3ca   :  { %915 = vsyncpa [#allocation3 + $0x1], 1 }
 0x3cb   :  { %916 = vsyncpa [#allocation5], 1 }
 0x3cc   :  { %918 = vsyncpa [#allocation5 + $0x1], 1 }
 0x3cd   :  { %919 = vsyncpa [#allocation8], 1 }

</bundles_post_ra>
